<compile_context>
chip_gen: v6e
topology: v6e:2x2x1
jax: 0.10.0
libtpu: 0.0.40
codegen_flags: <defaults>
</compile_context>

<pallas_src>
import functools

import jax
import jax.numpy as jnp
from jax.experimental import pallas as pl
from jax.experimental.pallas import tpu as pltpu


def _round_up(n: int, m: int) -> int:
    return ((n + m - 1) // m) * m


def _vmem_cap_bytes() -> int:
    """Generation-aware usable-VMEM cap (fraction of physical per-core VMEM)."""
    phys = 64 << 20  # conservative fallback: v7x has the smallest VMEM (64 MiB/TC)
    try:
        info = pltpu.get_tpu_info()
        phys = int(getattr(info, "vmem_capacity_bytes", phys))
    except Exception:
        pass
    frac = 0.75 if phys >= (100 << 20) else 0.60
    return int(frac * phys)


def renet_kernel(x_ref, w1_ref, b1_ref, w2_ref, b2_ref, o_ref, acc_ref):
    """One (batch-tile, hidden-chunk) grid step of the fused MLP."""
    h = pl.program_id(1)

    @pl.when(h == 0)
    def _():
        acc_ref[...] = jnp.zeros_like(acc_ref)

    # hidden chunk: relu(x @ W1[:, chunk] + b1[chunk]), accumulated in f32 on the MXU.
    hid = jnp.dot(x_ref[...], w1_ref[...], preferred_element_type=jnp.float32)
    hid = jnp.maximum(hid + b1_ref[...], 0.0)  # b1 chunk (1, th) broadcasts over batch

    # accumulate this chunk's contribution to the output: += hid @ W2[chunk, :]
    acc_ref[...] += jnp.dot(hid.astype(w2_ref.dtype), w2_ref[...],
                            preferred_element_type=jnp.float32)

    @pl.when(h == pl.num_programs(1) - 1)
    def _():
        o_ref[...] = (acc_ref[...] + b2_ref[...]).astype(o_ref.dtype)


@functools.partial(jax.jit, static_argnames=("block_b", "block_h", "use_bf16"))
def renet_forward(x, w1, b1, w2, b2, *, block_b=None, block_h: int = 512,
                  use_bf16: bool = False):
    """Fused Linear->ReLU->Linear. x:(B,F), w1:(F,H), b1:(1,H), w2:(H,O), b2:(1,O)."""
    B, F = x.shape
    Fw, H = w1.shape
    Hw, O = w2.shape
    assert Fw == F and Hw == H and b1.shape == (1, H) and b2.shape == (1, O)

    out_dtype = x.dtype
    compute_dtype = jnp.bfloat16 if use_bf16 else x.dtype
    bpe = jnp.dtype(compute_dtype).itemsize
    out_bpe = jnp.dtype(out_dtype).itemsize

    # --- tiling --------------------------------------------------------------
    # Lane multiple for the matmul N dims (H, O): 256 fills the 2x256x256 bf16
    # MXUs on v6e/v7x; 128 is enough for f32 / v5e.
    lane = 256 if use_bf16 else 128
    th = min(_round_up(H, lane), _round_up(max(block_h, lane), lane))
    Hp = _round_up(H, th)           # padded hidden width (zero columns are inert)
    Op = _round_up(O, lane)         # lane-dense output panel (no masked vst)

    # Batch tile: multiple of 8, aim for >=4 grid steps when B allows so
    # double-buffering pipelines and the "parallel" axis can shard 2 TCs on v7x.
    if block_b is None:
        tb = min(1024, _round_up(max(pl.cdiv(B, 4), 8), 8))
    else:
        tb = _round_up(max(block_b, 8), 8)
    tb = min(tb, _round_up(B, 8))
    if B < 8:
        tb = B  # full-array-dim block is allowed by the (8,128) rule

    # --- VMEM budget (shrink tb until the double-buffered tiles fit) ----------
    cap = _vmem_cap_bytes()

    def vmem_needed(tb_):
        return (2 * tb_ * F * bpe          # x tile (double-buffered)
                + 2 * F * th * bpe         # W1 chunk
                + 2 * th * 4               # b1 chunk (f32)
                + 2 * th * Op * bpe        # W2 chunk
                + 2 * Op * 4               # b2 (f32)
                + 2 * tb_ * Op * out_bpe   # out tile
                + tb_ * Op * 4             # accumulator scratch (f32)
                + tb_ * th * 4)            # hidden intermediate headroom (f32)

    while tb > 8 and vmem_needed(tb) > cap:
        tb = max(8, _round_up(tb // 2, 8))

    vmem_limit = int(min(cap, max(16 << 20, int(1.5 * vmem_needed(tb)))))

    grid_b = pl.cdiv(B, tb)
    grid_h = Hp // th

    # --- pad only weights / biases (x is passed through unpadded) -------------
    xc = x.astype(compute_dtype)
    w1p = jnp.pad(w1, ((0, 0), (0, Hp - H))).astype(compute_dtype)
    b1p = jnp.pad(b1, ((0, 0), (0, Hp - H))).astype(jnp.float32)
    w2p = jnp.pad(w2, ((0, Hp - H), (0, Op - O))).astype(compute_dtype)
    b2p = jnp.pad(b2, ((0, 0), (0, Op - O))).astype(jnp.float32)

    cost = pl.CostEstimate(
        flops=2 * B * (F * Hp + Hp * Op),
        transcendentals=0,
        bytes_accessed=int(bpe * (B * F + F * Hp + Hp * Op)
                           + 4 * (Hp + Op) + out_bpe * B * Op),
    )

    out_padded = pl.pallas_call(
        renet_kernel,
        out_shape=jax.ShapeDtypeStruct((B, Op), out_dtype),
        grid=(grid_b, grid_h),
        in_specs=[
            pl.BlockSpec((tb, F), lambda i, h: (i, 0)),    # x tile (F = full dim)
            pl.BlockSpec((F, th), lambda i, h: (0, h)),    # W1 hidden chunk
            pl.BlockSpec((1, th), lambda i, h: (0, h)),    # b1 chunk
            pl.BlockSpec((th, Op), lambda i, h: (h, 0)),   # W2 hidden chunk
            pl.BlockSpec((1, Op), lambda i, h: (0, 0)),    # b2
        ],
        out_specs=pl.BlockSpec((tb, Op), lambda i, h: (i, 0)),  # lane-dense store
        scratch_shapes=[pltpu.VMEM((tb, Op), jnp.float32)],     # f32 accumulator
        compiler_params=pltpu.CompilerParams(
            dimension_semantics=("parallel", "arbitrary"),
            vmem_limit_bytes=vmem_limit,
        ),
        cost_estimate=cost,
    )(xc, w1p, b1p, w2p, b2p)

    # TODO(synk): for very large n_features, add a K (feature) reduction grid axis
    # so the x row / W1 chunk no longer carry the full F width per step.
    return out_padded[:, :O]


if __name__ == "__main__":
    # Small shapes consistent with the MLP: batch=8, n_features=16, n_hidden=32, n_output=8
    B, n_features, n_hidden, n_output = 8, 16, 32, 8

    key = jax.random.PRNGKey(0)
    kx, k1, k2, k3, k4 = jax.random.split(key, 5)

    x = jax.random.normal(kx, (B, n_features), dtype=jnp.float32)
    # Parameters stored as (in_dim, out_dim) — transposed relative to torch.nn.Linear.
    w1 = jax.random.normal(k1, (n_features, n_hidden), dtype=jnp.float32) * 0.1
    b1 = jax.random.normal(k2, (1, n_hidden), dtype=jnp.float32) * 0.1
    w2 = jax.random.normal(k3, (n_hidden, n_output), dtype=jnp.float32) * 0.1
    b2 = jax.random.normal(k4, (1, n_output), dtype=jnp.float32) * 0.1

    # f32 path: tight tolerance against the pure-JAX reference.
    out = renet_forward(x, w1, b1, w2, b2)
    jax.block_until_ready(out)
    ref = jnp.maximum(x @ w1 + b1, 0.0) @ w2 + b2
    assert out.shape == (B, n_output)
    assert jnp.allclose(out, ref, atol=1e-5, rtol=1e-5)

    # bf16 fast path (bf16 operands, f32 accumulation): looser tolerance.
    out_bf16 = renet_forward(x, w1, b1, w2, b2, use_bf16=True)
    jax.block_until_ready(out_bf16)
    assert out_bf16.shape == (B, n_output)
    assert jnp.allclose(out_bf16.astype(jnp.float32), ref, atol=5e-2, rtol=5e-2)

    print("KERNEL_OK")
</pallas_src>

<mosaic_0001>
module attributes {stable_mosaic.version = 11 : i64} {
  func.func @renet_kernel(%arg0: i32, %arg1: i32, %arg2: memref<8x16xf32, #tpu.memory_space<vmem>>, %arg3: memref<16x128xf32, #tpu.memory_space<vmem>>, %arg4: memref<1x128xf32, #tpu.memory_space<vmem>>, %arg5: memref<128x128xf32, #tpu.memory_space<vmem>>, %arg6: memref<1x128xf32, #tpu.memory_space<vmem>>, %arg7: memref<8x128xf32, #tpu.memory_space<vmem>>, %arg8: memref<8x128xf32, #tpu.memory_space<vmem>>) attributes {dimension_semantics = [#tpu.dimension_semantics<parallel>, #tpu.dimension_semantics<arbitrary>], iteration_bounds = array<i64: 1, 1>, scalar_prefetch = 0 : i64, scratch_operands = 1 : i64, tpu.core_type = #tpu.core_type<tc>, window_params = [{transform_indices = @transform_0, window_bounds = array<i64: 8, 16>}, {transform_indices = @transform_1, window_bounds = array<i64: 16, 128>}, {transform_indices = @transform_2, window_bounds = array<i64: 1, 128>}, {transform_indices = @transform_3, window_bounds = array<i64: 128, 128>}, {pipeline_mode = #tpu.pipeline_mode<synchronous>, transform_indices = @transform_4, window_bounds = array<i64: 1, 128>}, {transform_indices = @transform_5, window_bounds = array<i64: 8, 128>}]} {
    %c0_i32 = arith.constant 0 : i32
    %0 = arith.cmpi eq, %arg1, %c0_i32 : i32
    %1 = arith.extui %0 : i1 to i32
    %c0_i32_0 = arith.constant 0 : i32
    %2 = arith.cmpi ne, %1, %c0_i32_0 : i32
    scf.if %2 {
      %cst_16 = arith.constant 0.000000e+00 : f32
      %19 = vector.broadcast %cst_16 : f32 to vector<8x128xf32>
      %c0_17 = arith.constant 0 : index
      %c0_18 = arith.constant 0 : index
      %20 = vector.load %arg8[%c0_17, %c0_18] : memref<8x128xf32, #tpu.memory_space<vmem>>, vector<8x128xf32>
      tpu.vector_store %arg8[%c0_17, %c0_18], %19 {strides = array<i32>} : memref<8x128xf32, #tpu.memory_space<vmem>>, vector<8x128xf32>,
    } else {
    }
    %c0 = arith.constant 0 : index
    %c0_1 = arith.constant 0 : index
    %3 = vector.load %arg2[%c0, %c0_1] : memref<8x16xf32, #tpu.memory_space<vmem>>, vector<8x16xf32>
    %c0_2 = arith.constant 0 : index
    %c0_3 = arith.constant 0 : index
    %4 = vector.load %arg3[%c0_2, %c0_3] : memref<16x128xf32, #tpu.memory_space<vmem>>, vector<16x128xf32>
    %cst = arith.constant dense<0.000000e+00> : vector<8x128xf32>
    %5 = tpu.matmul %3, %4, %cst {dimension_numbers = #tpu.dot_dimension_numbers<[1], [0], [0], [1], [0, 0, 1, 1], [], []>} : vector<8x16xf32>, vector<16x128xf32>, vector<8x128xf32> -> vector<8x128xf32>
    %c0_4 = arith.constant 0 : index
    %c0_5 = arith.constant 0 : index
    %6 = vector.load %arg4[%c0_4, %c0_5] : memref<1x128xf32, #tpu.memory_space<vmem>>, vector<1x128xf32>
    %7 = vector.broadcast %6 : vector<1x128xf32> to vector<8x128xf32>
    %8 = arith.addf %5, %7 : vector<8x128xf32>
    %cst_6 = arith.constant 0.000000e+00 : f32
    %9 = vector.broadcast %cst_6 : f32 to vector<8x128xf32>
    %10 = arith.maximumf %8, %9 : vector<8x128xf32>
    %c0_7 = arith.constant 0 : index
    %c0_8 = arith.constant 0 : index
    %11 = vector.load %arg8[%c0_7, %c0_8] : memref<8x128xf32, #tpu.memory_space<vmem>>, vector<8x128xf32>
    %c0_9 = arith.constant 0 : index
    %c0_10 = arith.constant 0 : index
    %12 = vector.load %arg5[%c0_9, %c0_10] : memref<128x128xf32, #tpu.memory_space<vmem>>, vector<128x128xf32>
    %cst_11 = arith.constant dense<0.000000e+00> : vector<8x128xf32>
    %13 = tpu.matmul %10, %12, %cst_11 {dimension_numbers = #tpu.dot_dimension_numbers<[1], [0], [0], [1], [0, 0, 1, 1], [], []>} : vector<8x128xf32>, vector<128x128xf32>, vector<8x128xf32> -> vector<8x128xf32>
    %14 = arith.addf %11, %13 : vector<8x128xf32>
    %c0_12 = arith.constant 0 : index
    %c0_13 = arith.constant 0 : index
    %15 = vector.load %arg8[%c0_12, %c0_13] : memref<8x128xf32, #tpu.memory_space<vmem>>, vector<8x128xf32>
    tpu.vector_store %arg8[%c0_12, %c0_13], %14 {strides = array<i32>} : memref<8x128xf32, #tpu.memory_space<vmem>>, vector<8x128xf32>,
    %c0_i32_14 = arith.constant 0 : i32
    %16 = arith.cmpi eq, %arg1, %c0_i32_14 : i32
    %17 = arith.extui %16 : i1 to i32
    %c0_i32_15 = arith.constant 0 : i32
    %18 = arith.cmpi ne, %17, %c0_i32_15 : i32
    scf.if %18 {
      %c0_16 = arith.constant 0 : index
      %c0_17 = arith.constant 0 : index
      %19 = vector.load %arg8[%c0_16, %c0_17] : memref<8x128xf32, #tpu.memory_space<vmem>>, vector<8x128xf32>
      %c0_18 = arith.constant 0 : index
      %c0_19 = arith.constant 0 : index
      %20 = vector.load %arg6[%c0_18, %c0_19] : memref<1x128xf32, #tpu.memory_space<vmem>>, vector<1x128xf32>
      %21 = vector.broadcast %20 : vector<1x128xf32> to vector<8x128xf32>
      %22 = arith.addf %19, %21 : vector<8x128xf32>
      %c0_20 = arith.constant 0 : index
      %c0_21 = arith.constant 0 : index
      %23 = vector.load %arg7[%c0_20, %c0_21] : memref<8x128xf32, #tpu.memory_space<vmem>>, vector<8x128xf32>
      tpu.vector_store %arg7[%c0_20, %c0_21], %22 {strides = array<i32>} : memref<8x128xf32, #tpu.memory_space<vmem>>, vector<8x128xf32>,
    } else {
    }
    return
  }
  func.func @transform_0(%arg0: i32, %arg1: i32) -> (i32, i32) {
    %c0_i32 = arith.constant 0 : i32
    %c0_i32_0 = arith.constant 0 : i32
    return %arg0, %c0_i32 : i32, i32
  }
  func.func @transform_1(%arg0: i32, %arg1: i32) -> (i32, i32) {
    %c0_i32 = arith.constant 0 : i32
    %c0_i32_0 = arith.constant 0 : i32
    return %c0_i32, %arg1 : i32, i32
  }
  func.func @transform_2(%arg0: i32, %arg1: i32) -> (i32, i32) {
    %c0_i32 = arith.constant 0 : i32
    %c0_i32_0 = arith.constant 0 : i32
    return %c0_i32, %arg1 : i32, i32
  }
  func.func @transform_3(%arg0: i32, %arg1: i32) -> (i32, i32) {
    %c0_i32 = arith.constant 0 : i32
    %c0_i32_0 = arith.constant 0 : i32
    return %arg1, %c0_i32 : i32, i32
  }
  func.func @transform_4(%arg0: i32, %arg1: i32) -> (i32, i32) {
    %c0_i32 = arith.constant 0 : i32
    %c0_i32_0 = arith.constant 0 : i32
    %c0_i32_1 = arith.constant 0 : i32
    return %c0_i32, %c0_i32_0 : i32, i32
  }
  func.func @transform_5(%arg0: i32, %arg1: i32) -> (i32, i32) {
    %c0_i32 = arith.constant 0 : i32
    %c0_i32_0 = arith.constant 0 : i32
    return %arg0, %c0_i32 : i32, i32
  }
}

</mosaic_0001>

<bundles_post_ra>
// kernel: renet_forward.1
= control target key start
LH: loop header
LB: loop body
LE: loop exit
PB: predicated region body
PF: predicated region fallthrough
CT: control target
= control target key end

     0   :  { %v317_v1 = vmov 0.0   ;;  %vm318_vm0 = vmmov 0   ;;  %vm36_vm1 = vcmask 130048   ;;  %s418_s0 = inlined_call_operand.vmem [shape: f32[8,16], index: 0, kind: input, shape index: {}]   ;;  %s419_s1 = inlined_call_operand.vmem [shape: f32[16,128], index: 1, kind: input, shape index: {}]   ;;  %s420_s2 = inlined_call_operand.vmem [shape: f32[1,128], index: 2, kind: input, shape index: {}]   ;;  %s421_s3 = inlined_call_operand.vmem [shape: f32[128,128], index: 3, kind: input, shape index: {}]   ;;  %s422_s4 = inlined_call_operand.vmem [shape: f32[1,128], index: 4, kind: input, shape index: {}]   ;;  %s423_s5 = inlined_call_operand.hbm [shape: f32[8,128], index: 5, kind: output, shape index: {}]  }
   0x1   :  { %v28_v0 = vld [vmem:[%s419_s1 + $0x8] sm:$0xff]  ;;  %250 = vmatprep.subr.mxu0 %v317_v1  ;;  %v27_v2 = vld [vmem:[%s419_s1] sm:$0xff]  ;;  %254 = vmatprep.mubr.msk.f32.mxu0 %vm318_vm0, %v317_v1  ;;  %v127_v3 = vld [vmem:[%s421_s3 + $0x78] sm:$0xff] }
   0x2   :  { %251 = vmatpush3.msra.mxu0 %v28_v0  ;;  %v26_v4 = vld [vmem:[%s418_s0] sm:$0xff]  ;;  %257 = vmatprep.subr.mxu1 %v317_v1  ;;  %v126_v5 = vld [vmem:[%s421_s3 + $0x70] sm:$0xff]  ;;  %v125_v6 = vld [vmem:[%s421_s3 + $0x68] sm:$0xff] }
   0x3   :  { %252 = vmatprep.subr.mxu0 %v317_v1  ;;  %258 = vmatpush3.msra.mxu1 %v127_v3 }
   0x4   :  { %253 = vmatpush3.msra.mxu0 %v27_v2  ;;  %259 = vmatprep.subr.mxu1 %v317_v1 }
   0x5   :  { %255 = vmatmul.mubr.msk.f32.vlgmr.msra.gmra.mxu0 %vm36_vm1, %v26_v4  ;;  %260 = vmatpush3.msra.mxu1 %v126_v5 }
   0x6   :  { %10 = vsyncpa [#allocation4], 0  ;;  %261 = vmatprep.subr.mxu1 %v317_v1  ;;  %v124_v7 = vld [vmem:[%s421_s3 + $0x60] sm:$0xff]  ;;  %289 = vmatprep.mubr.msk.f32.mxu1 %vm318_vm0, %v317_v1  ;;  %v123_v8 = vld [vmem:[%s421_s3 + $0x58] sm:$0xff]  ;;  %s319_s6 = smov [#allocation3]  }
   0x7   :  { %262 = vmatpush3.msra.mxu1 %v125_v6  ;;  %v122_v9 = vld [vmem:[%s421_s3 + $0x50] sm:$0xff]  ;;  %v121_v10 = vld [vmem:[%s421_s3 + $0x48] sm:$0xff]  ;;  %v120_v11 = vld [vmem:[%s421_s3 + $0x40] sm:$0xff]  ;;  %s219_s7 = sshll.u32 %s319_s6, 4  ;;  %s220_s7 = int_to_ptr.vmem [resolvable:$true] %s219_s7 }
   0x8   :  { %263 = vmatprep.subr.mxu1 %v317_v1  ;;  %v119_v12 = vld [vmem:[%s421_s3 + $0x38] sm:$0xff]  ;;  %v118_v13 = vld [vmem:[%s421_s3 + $0x30] sm:$0xff]  ;;  %v117_v14 = vld [vmem:[%s421_s3 + $0x28] sm:$0xff]  ;;  %p300_p1 = scmp.lt.s32.totalorder %s220_s7, %s220_s7 }
   0x9   :  { %264 = vmatpush3.msra.mxu1 %v124_v7  ;;  %v116_v15 = vld [vmem:[%s421_s3 + $0x20] sm:$0xff]  ;;  %v115_v16 = vld [vmem:[%s421_s3 + $0x18] sm:$0xff]  ;;  %v114_v17 = vld [vmem:[%s421_s3 + $0x10] sm:$0xff] }
   0xa   :  { %265 = vmatprep.subr.mxu1 %v317_v1  ;;  %v113_v18 = vld [vmem:[%s421_s3 + $0x8] sm:$0xff]  ;;  %v112_v19 = vld [vmem:[%s421_s3] sm:$0xff]  ;;  %s295_s3 = scalar_lea.vmem %s220_s7, 128 }
   0xb   :  { %266 = vmatpush3.msra.mxu1 %v123_v8  ;;  %v227_v20 = vld [vmem:[%s420_s2] ss:$0 sm:$0xff]  ;;  %p296_p0 = scmp.ne.s32.totalorder %s220_s7, %s295_s3  ;;  %p301_p2 = scmp.lt.s32.totalorder %s295_s3, %s295_s3 }
   0xc   :  { %267 = vmatprep.subr.mxu1 %v317_v1  ;;  %v229_v25 = vld [vmem:[%s422_s4] ss:$0 sm:$0xff] }
   0xd   :  { %268 = vmatpush3.msra.mxu1 %v122_v9  ;;  %p302_p3 = por %p301_p2, %p300_p1 }
   0xe   :  { %269 = vmatprep.subr.mxu1 %v317_v1 }
   0xf   :  { %270 = vmatpush3.msra.mxu1 %v121_v10  ;;  %p303_p4 = pnand %p302_p3, %p296_p0 }
  0x10   :  { %271 = vmatprep.subr.mxu1 %v317_v1 }
  0x11   :  { %272 = vmatpush3.msra.mxu1 %v120_v11 }
  0x12   :  { %273 = vmatprep.subr.mxu1 %v317_v1 }
  0x13   :  { %274 = vmatpush3.msra.mxu1 %v119_v12 }
  0x14   :  { %275 = vmatprep.subr.mxu1 %v317_v1 }
  0x15   :  { %276 = vmatpush3.msra.mxu1 %v118_v13 }
  0x16   :  { %277 = vmatprep.subr.mxu1 %v317_v1 }
  0x17   :  { %278 = vmatpush3.msra.mxu1 %v117_v14 }
  0x18   :  { %279 = vmatprep.subr.mxu1 %v317_v1 }
  0x19   :  { %280 = vmatpush3.msra.mxu1 %v116_v15 }
  0x1a   :  { %281 = vmatprep.subr.mxu1 %v317_v1 }
  0x1b   :  { %282 = vmatpush3.msra.mxu1 %v115_v16 }
  0x1c   :  { %283 = vmatprep.subr.mxu1 %v317_v1 }
  0x1d   :  { %284 = vmatpush3.msra.mxu1 %v114_v17 }
  0x1e   :  { %285 = vmatprep.subr.mxu1 %v317_v1 }
  0x1f   :  { %286 = vmatpush3.msra.mxu1 %v113_v18 }
  0x20   :  { %287 = vmatprep.subr.mxu1 %v317_v1 }
  0x21   :  { %288 = vmatpush3.msra.mxu1 %v112_v19 }
  0xc5   :  { %v106_v21 = vpop.f32.mrf.mxu0 }
  0xc6   :  { %v107_v22 = vadd.f32 %v227_v20, %v106_v21 }
  0xc7   :  { %v256_v23 = vpop.f32.mrf.mxu0 }
  0xc8   :  { %v110_v24 = vmax.f32 %v107_v22, 0.0 }
  0xca   :  { %290 = vmatmul.mubr.f32.vlgmr.msra.gmra.mxu1 %v110_v24 }
 0x18a   :  { %v194_v26 = vpop.f32.mrf.mxu1 }
 0x18b   :  { %v211_v27 = vadd.f32 %v229_v25, %v194_v26 }
 0x18c   :  { %v291_v28 = vpop.f32.mrf.mxu1 }
 0x18d   :  { %212 = vst [vmem:[#allocation3] sm:$0xff] %v211_v27 }
 0x18e   :  { %306 = shalt.err (!%p303_p4)
}
 0x18f   :  { %222 = dma.vmem_to_hbm [thread:$0]  %s220_s7, 128, %s423_s5, [#allocation4]  }
 0x190   :  { %315 = dma.done.wait [#allocation4], 128  }
 0x191   :  { %316 = vsyncadd [#allocation4], 4294967168 }
 0x192   :  { %226 = vsyncpa [#allocation4], 1 }

</bundles_post_ra>
